<compile_context>
chip_gen: v5e
topology: v5e:2x2
jax: 0.10.0
libtpu: 0.0.40
codegen_flags: <defaults>
</compile_context>

<pallas_src>
import jax
import jax.numpy as jnp
from jax import lax
from jax.experimental import pallas as pl
from jax.experimental.pallas import tpu as pltpu

# ----- small synthetic dimensions (stand-ins for GloVe-300 / Turian-50) -----
GLOVE_DIM = 32
TURIAN_DIM = 16
CHAR_DIM = 8        # CharCNN char_dim -> conv "width" axis
CHAR_FILTERS = 8    # CharCNN filters
PAD_SIZE = 15       # CharCNN.pad_size -> conv in_channels
HIDDEN_DIM = 32     # LSTM hidden_dim (4H = 128 lanes per direction)
N_LAYERS = 2

EMBED_DIM = GLOVE_DIM + TURIAN_DIM + CHAR_FILTERS        # 56 real features
EMBED_PAD = 128                                          # lane-aligned embed slab
CHAR_K = CHAR_DIM * PAD_SIZE                             # 120 im2col rows
CHAR_POS = sum(CHAR_DIM - k + 1 for k in (3, 4, 5))      # 15 conv output positions
CHAR_TILE = 128                                          # padded K / output lanes

_VMEM = pl.BlockSpec(memory_space=pltpu.MemorySpace.VMEM)


def _round_up(x, m):
    return -(-x // m) * m


# ---------------------------------------------------------------------------
# Fused embedding kernel: CharCNN (im2col matmul + ReLU + roll-tree max-pool)
# concatenated with the GloVe / Turian embeddings into a 128-lane slab.
# ---------------------------------------------------------------------------
def _embed_kernel(glove_ref, turian_ref, cx_ref, w_ref, b_ref, out_ref):
    """cx: (TM,128) bf16 im2col chars; w: (128,128) bf16; b: (1,128) f32.
    out: (TM,128) f32 = [glove | turian | char_feat | zero pad] (lane-dense store)."""
    y = jnp.dot(cx_ref[...], w_ref[...], preferred_element_type=jnp.float32)
    y = jnp.maximum(y + b_ref[...], 0.0)          # bias + ReLU; 16 blocks x 8 filters
    # max_pool1d over all conv positions == max over the 16 position blocks.
    # Block 16 is zero padding, harmless because every real block is ReLU'd (>= 0).
    m = jnp.maximum(y, pltpu.roll(y, 64, 1))
    m = jnp.maximum(m, pltpu.roll(m, 32, 1))
    m = jnp.maximum(m, pltpu.roll(m, 16, 1))
    m = jnp.maximum(m, pltpu.roll(m, 8, 1))
    char_feat = m[:, 0:CHAR_FILTERS]
    zpad = jnp.zeros((glove_ref.shape[0], EMBED_PAD - EMBED_DIM), jnp.float32)
    out_ref[...] = jnp.concatenate(
        [glove_ref[...], turian_ref[...], char_feat, zpad], axis=1)


def _build_charcnn_im2col(params):
    """Zero-padded block-Toeplitz weight covering conv k=3,4,5 at every output
    position, padded to a lane/sublane aligned (128,128) tile.  Columns are
    position-major (8 filter lanes per position block) for the roll-tree max."""
    L, C, F = CHAR_DIM, PAD_SIZE, CHAR_FILTERS
    cols, biases = [], []
    for k in (3, 4, 5):
        w = params[f"conv{k}_w"]                 # (F, C, k)  PyTorch Conv1d layout
        b = params[f"conv{k}_b"]                 # (F,)
        w_t = jnp.transpose(w, (2, 1, 0))        # (k, C, F)
        for p in range(L - k + 1):               # conv output positions
            blk = jnp.zeros((L, C, F), jnp.float32).at[p:p + k].set(w_t)
            cols.append(blk.reshape(L * C, F))   # row index = l*C + c
            biases.append(b)
    w_big = jnp.concatenate(cols, axis=1)                        # (120, 120)
    b_big = jnp.concatenate(biases)[None, :]                     # (1, 120)
    w_big = jnp.pad(w_big, ((0, CHAR_TILE - CHAR_K), (0, CHAR_TILE - CHAR_POS * F)))
    b_big = jnp.pad(b_big, ((0, 0), (0, CHAR_TILE - CHAR_POS * F)))
    return w_big.astype(jnp.bfloat16), b_big.astype(jnp.float32)


def charcnn_embed_tokens(tokens, vocab_stoi, char_stoi, params, packed):
    """Embed every document token -> (n_total, 128) slab, lanes 0:56 = real embeds."""
    n = len(tokens)
    word_ids = jnp.array([vocab_stoi.get(t, 0) for t in tokens], jnp.int32)
    glove = jnp.take(params["glove_w"], word_ids, axis=0)        # (n, 32)
    turian = jnp.take(params["turian_w"], word_ids, axis=0)      # (n, 16)
    char_ids = jnp.array(
        [[char_stoi.get(c, 1) for c in t[:PAD_SIZE]]
         + [0] * (PAD_SIZE - min(len(t), PAD_SIZE)) for t in tokens], jnp.int32)
    char_emb = jnp.take(params["char_emb"], char_ids, axis=0)    # (n, 15, 8)
    # Conv1d sees (N, C=pad_size, W=char_dim); im2col row index = w*C + c.
    cx = jnp.transpose(char_emb, (0, 2, 1)).reshape(n, CHAR_K)

    n8 = _round_up(max(n, 1), 8)
    tile = n8 if n8 <= 256 else 256
    n_total = _round_up(n, tile)
    glove = jnp.pad(glove, ((0, n_total - n), (0, 0)))
    turian = jnp.pad(turian, ((0, n_total - n), (0, 0)))
    cx = jnp.pad(cx, ((0, n_total - n), (0, CHAR_TILE - CHAR_K))).astype(jnp.bfloat16)

    return pl.pallas_call(
        _embed_kernel,
        out_shape=jax.ShapeDtypeStruct((n_total, EMBED_PAD), jnp.float32),
        grid=(n_total // tile,),
        in_specs=[pl.BlockSpec((tile, GLOVE_DIM), lambda i: (i, 0)),
                  pl.BlockSpec((tile, TURIAN_DIM), lambda i: (i, 0)),
                  pl.BlockSpec((tile, CHAR_TILE), lambda i: (i, 0)),
                  pl.BlockSpec((CHAR_TILE, CHAR_TILE), lambda i: (0, 0)),
                  pl.BlockSpec((1, CHAR_TILE), lambda i: (0, 0))],
        out_specs=pl.BlockSpec((tile, EMBED_PAD), lambda i: (i, 0)),
        compiler_params=pltpu.CompilerParams(
            dimension_semantics=("parallel",)),
    )(glove, turian, cx, packed["char_w"], packed["char_b"])


# ---------------------------------------------------------------------------
# Fused 2-layer bidirectional LSTM over all (right-padded) sentences at once.
# ---------------------------------------------------------------------------
def _make_bilstm_kernel(T, S, H):
    """Rows are time-major: row = t*S + s; S (padded sentence count) is a multiple
    of 8 so every per-step row window is sublane aligned."""
    G = 4 * H
    unroll = T if T <= 16 else 8        # bounded partial unroll for long documents

    def kernel(x_ref, mask_ref, wih1_ref, whh1f_ref, whh1b_ref, b1_ref,
               wih2_ref, whh2f_ref, whh2b_ref, b2_ref,
               out_ref, gx_ref, h1_ref):

        def run_layer(whhf_ref, whhb_ref, write_out):
            whh_f = whhf_ref[...]                    # (H, 4H) bf16, vreg resident
            whh_b = whhb_ref[...]

            def cell(g4, c_prev):                    # PyTorch gate order: i, f, g, o
                i_g = jax.nn.sigmoid(g4[:, 0:H])
                f_g = jax.nn.sigmoid(g4[:, H:2 * H])
                g_g = jnp.tanh(g4[:, 2 * H:3 * H])
                o_g = jax.nn.sigmoid(g4[:, 3 * H:4 * H])
                c_new = f_g * c_prev + i_g * g_g
                return o_g * jnp.tanh(c_new), c_new

            def step(r, carry):
                h_f, c_f, h_b, c_b = carry           # (S, H) f32 each
                tb = T - 1 - r
                rowf = pl.multiple_of(r * S, S)
                rowb = pl.multiple_of(tb * S, S)
                # Pre-gates were hoisted into one big matmul; slice + add recurrent.
                gxf = gx_ref[pl.ds(rowf, S), :][:, 0:G]
                gxb = gx_ref[pl.ds(rowb, S), :][:, G:2 * G]
                gf = gxf + jnp.dot(h_f.astype(jnp.bfloat16), whh_f,
                                   preferred_element_type=jnp.float32)
                gb = gxb + jnp.dot(h_b.astype(jnp.bfloat16), whh_b,
                                   preferred_element_type=jnp.float32)
                h_f, c_f = cell(gf, c_f)
                h_bn, c_bn = cell(gb, c_b)
                # Right padding: pin the backward carry at zero over padded steps so
                # it is still zero when the last real token of each sentence arrives.
                m_b = mask_ref[pl.ds(rowb, S), :]    # (S, 1), 0.0 over padding
                h_b = h_bn * m_b
                c_b = c_bn * m_b
                write_out(rowf, rowb, h_f, h_b)
                return (h_f, c_f, h_b, c_b)

            z = jnp.zeros((S, H), jnp.float32)
            lax.fori_loop(0, T, step, (z, z, z, z), unroll=unroll)

        # --- layer 1: both directions' input projections in one bf16 matmul ------
        gx_ref[...] = (jnp.dot(x_ref[...], wih1_ref[...],
                               preferred_element_type=jnp.float32)
                       + b1_ref[...]).astype(gx_ref.dtype)

        def write_h1(rowf, rowb, h_f, h_b):          # layer-1 states stay in VMEM,
            h1_ref[pl.ds(rowf, S), 0:H] = h_f.astype(h1_ref.dtype)     # stored bf16
            h1_ref[pl.ds(rowb, S), H:2 * H] = h_b.astype(h1_ref.dtype)

        run_layer(whh1f_ref, whh1b_ref, write_h1)

        # --- layer 2: project layer-1 states (already bf16), recur, emit output --
        gx_ref[...] = (jnp.dot(h1_ref[...], wih2_ref[...],
                               preferred_element_type=jnp.float32)
                       + b2_ref[...]).astype(gx_ref.dtype)

        def write_o(rowf, rowb, h_f, h_b):
            out_ref[pl.ds(rowf, S), 0:H] = h_f
            out_ref[pl.ds(rowb, S), H:2 * H] = h_b

        run_layer(whh2f_ref, whh2b_ref, write_o)

    return kernel


def bilstm_forward(x_tm, mask, lstm_packed):
    """x_tm: (T, S_pad, 128) right-padded, time-major; mask: (T, S_pad) {0,1}.
    Returns (T, S_pad, 2H) f32 layer-2 hidden states (fwd | bwd)."""
    T, S, _ = x_tm.shape
    H = HIDDEN_DIM
    rows = T * S
    x2d = x_tm.reshape(rows, EMBED_PAD).astype(jnp.bfloat16)
    m2d = mask.reshape(rows, 1).astype(jnp.float32)
    l1, l2 = lstm_packed

    def _nbytes(a):
        return a.size * a.dtype.itemsize
    weight_bytes = sum(_nbytes(w) for w in
                       (l1["wih"], l1["whh_f"], l1["whh_b"], l1["b"],
                        l2["wih"], l2["whh_f"], l2["whh_b"], l2["b"]))
    vmem_bytes = (_nbytes(x2d) + _nbytes(m2d) + weight_bytes
                  + rows * 2 * H * 4          # f32 output
                  + rows * 8 * H * 2          # bf16 pre-gate scratch
                  + rows * 2 * H * 2)         # bf16 layer-1 state scratch
    cp = pltpu.CompilerParams(
        vmem_limit_bytes=int(min(max(2 * vmem_bytes, 32 << 20), 100 << 20)))
    # TODO(synk): for very long documents on v7x (64 MiB VMEM), compute the layer-2
    # pre-gates in time chunks instead of one whole-document gx scratch, and batch
    # multiple documents on a leading parallel grid axis to use both TensorCores.

    out = pl.pallas_call(
        _make_bilstm_kernel(T, S, H),
        out_shape=jax.ShapeDtypeStruct((rows, 2 * H), jnp.float32),
        in_specs=[_VMEM] * 10,
        out_specs=_VMEM,
        scratch_shapes=[pltpu.VMEM((rows, 8 * H), jnp.bfloat16),   # pre-gates
                        pltpu.VMEM((rows, 2 * H), jnp.bfloat16)],  # layer-1 states
        compiler_params=cp,
    )(x2d, m2d, l1["wih"], l1["whh_f"], l1["whh_b"], l1["b"],
      l2["wih"], l2["whh_f"], l2["whh_b"], l2["b"])
    return out.reshape(T, S, 2 * H)


# ---------------------------------------------------------------------------
# One-time weight packing (hoisted out of the per-document forward).
# ---------------------------------------------------------------------------
def prepare_params(params):
    packed = {}
    packed["char_w"], packed["char_b"] = _build_charcnn_im2col(params)
    packed["lstm"] = []
    for layer, p in enumerate(params["lstm"]):
        din = p["w_ih_f"].shape[1]
        wih = jnp.concatenate([p["w_ih_f"].T, p["w_ih_b"].T], axis=1)   # (din, 8H)
        if layer == 0:                       # pad rows to the 128-lane embed slab
            wih = jnp.pad(wih, ((0, EMBED_PAD - din), (0, 0)))
        b = jnp.concatenate([p["b_ih_f"] + p["b_hh_f"],
                             p["b_ih_b"] + p["b_hh_b"]])[None, :]       # (1, 8H)
        packed["lstm"].append(dict(
            wih=wih.astype(jnp.bfloat16),
            whh_f=p["w_hh_f"].T.astype(jnp.bfloat16),                   # (H, 4H)
            whh_b=p["w_hh_b"].T.astype(jnp.bfloat16),
            b=b.astype(jnp.float32)))
    return packed


# ---------------------------------------------------------------------------
# DocumentEncoder glue (lookups, padding, output extraction).
# ---------------------------------------------------------------------------
def document_encoder_forward(sents, vocab_stoi, char_stoi, params, packed):
    """Returns (states, embeds) exactly like DocumentEncoder.forward.
    emb_dropout / lstm_dropout in the reference act on discarded values (no-ops)."""
    lens = [len(s) for s in sents]
    S, T = len(sents), max(lens)
    S_pad = _round_up(S, 8)                        # sublane-aligned sentence rows
    tokens = [t for s in sents for t in s]
    n = len(tokens)

    emb_slab = charcnn_embed_tokens(tokens, vocab_stoi, char_stoi, params, packed)
    embeds = emb_slab[:n, :EMBED_DIM]

    # Right-pad into (S_pad, T, 128), then time-major for the fused BiLSTM.  The
    # 128-lane slab (zero tail) feeds the zero-row-padded layer-1 wih directly.
    x_pad = jnp.zeros((S_pad, T, EMBED_PAD), jnp.float32)
    off = 0
    for s, ln in enumerate(lens):
        x_pad = x_pad.at[s, :ln].set(emb_slab[off:off + ln])
        off += ln
    x_tm = jnp.transpose(x_pad, (1, 0, 2))
    lens_arr = jnp.array(lens + [0] * (S_pad - S), jnp.int32)
    mask = (jnp.arange(T)[:, None] < lens_arr[None, :]).astype(jnp.float32)

    out = bilstm_forward(x_tm, mask, packed["lstm"])          # (T, S_pad, 2H)

    # Un-pad / re-concatenate in original sentence order (== unpack_and_unpad).
    states = jnp.concatenate([out[:ln, s, :] for s, ln in enumerate(lens)], axis=0)
    return states, embeds


# ---------------------------------------------------------------------------
# Pure-JAX f32 reference (same math, no Pallas) for a tolerance check.
# ---------------------------------------------------------------------------
def reference_forward(sents, vocab_stoi, char_stoi, params):
    lens = [len(s) for s in sents]
    tokens = [t for s in sents for t in s]
    word_ids = jnp.array([vocab_stoi.get(t, 0) for t in tokens], jnp.int32)
    glove = jnp.take(params["glove_w"], word_ids, axis=0)
    turian = jnp.take(params["turian_w"], word_ids, axis=0)
    char_ids = jnp.array(
        [[char_stoi.get(c, 1) for c in t[:PAD_SIZE]]
         + [0] * (PAD_SIZE - min(len(t), PAD_SIZE)) for t in tokens], jnp.int32)
    ce = jnp.take(params["char_emb"], char_ids, axis=0)       # (n, pad, char_dim)
    x = jnp.transpose(ce, (0, 2, 1))                          # (n, W, C)
    blocks = []
    for k in (3, 4, 5):
        w, b = params[f"conv{k}_w"], params[f"conv{k}_b"]
        for p in range(CHAR_DIM - k + 1):
            o = jnp.einsum("njc,fcj->nf", x[:, p:p + k, :], w) + b
            blocks.append(jax.nn.relu(o))
    char_feat = jnp.max(jnp.stack(blocks, axis=0), axis=0)
    embeds = jnp.concatenate([glove, turian, char_feat], axis=1)

    H = HIDDEN_DIM

    def run_dir(xs, p, d, reverse):
        wih, whh = p[f"w_ih_{d}"], p[f"w_hh_{d}"]
        b = p[f"b_ih_{d}"] + p[f"b_hh_{d}"]

        def cell(carry, x_t):
            h, c = carry
            g = x_t @ wih.T + h @ whh.T + b
            i = jax.nn.sigmoid(g[0:H])
            f = jax.nn.sigmoid(g[H:2 * H])
            gg = jnp.tanh(g[2 * H:3 * H])
            o = jax.nn.sigmoid(g[3 * H:4 * H])
            c = f * c + i * gg
            h = o * jnp.tanh(c)
            return (h, c), h

        _, hs = lax.scan(cell, (jnp.zeros(H), jnp.zeros(H)), xs, reverse=reverse)
        return hs

    states, off = [], 0
    for ln in lens:
        h = embeds[off:off + ln]
        off += ln
        for p in params["lstm"]:
            h = jnp.concatenate([run_dir(h, p, "f", False),
                                 run_dir(h, p, "b", True)], axis=1)
        states.append(h)
    return jnp.concatenate(states, axis=0), embeds


# ---------------------------------------------------------------------------
# Deterministic parameter construction (synthetic; no checkpoint load).
# ---------------------------------------------------------------------------
def l2_normalize(w, eps=1e-12):
    norm = jnp.sqrt(jnp.sum(w * w, axis=1, keepdims=True))
    return w / jnp.maximum(norm, eps)


def init_params(key, n_words, n_chars):
    keys = jax.random.split(key, 5)
    params = {}
    params["glove_w"] = l2_normalize(
        jax.random.normal(keys[0], (n_words, GLOVE_DIM), jnp.float32))
    params["turian_w"] = l2_normalize(
        jax.random.normal(keys[1], (n_words, TURIAN_DIM), jnp.float32))
    char_emb = 0.1 * jax.random.normal(keys[2], (n_chars + 2, CHAR_DIM), jnp.float32)
    params["char_emb"] = char_emb.at[0].set(0.0)      # padding_idx = 0

    conv_keys = jax.random.split(keys[3], 6)
    for i, k in enumerate((3, 4, 5)):
        bound = 1.0 / (PAD_SIZE * k) ** 0.5
        params[f"conv{k}_w"] = jax.random.uniform(
            conv_keys[2 * i], (CHAR_FILTERS, PAD_SIZE, k), jnp.float32, -bound, bound)
        params[f"conv{k}_b"] = jax.random.uniform(
            conv_keys[2 * i + 1], (CHAR_FILTERS,), jnp.float32, -bound, bound)

    lstm_params, lkey = [], keys[4]
    bound = 1.0 / HIDDEN_DIM ** 0.5
    for layer in range(N_LAYERS):
        layer_in = EMBED_DIM if layer == 0 else 2 * HIDDEN_DIM
        p = {}
        for d in ("f", "b"):
            lkey, k1, k2, k3, k4 = jax.random.split(lkey, 5)
            p[f"w_ih_{d}"] = jax.random.uniform(
                k1, (4 * HIDDEN_DIM, layer_in), jnp.float32, -bound, bound)
            p[f"w_hh_{d}"] = jax.random.uniform(
                k2, (4 * HIDDEN_DIM, HIDDEN_DIM), jnp.float32, -bound, bound)
            p[f"b_ih_{d}"] = jax.random.uniform(
                k3, (4 * HIDDEN_DIM,), jnp.float32, -bound, bound)
            p[f"b_hh_{d}"] = jax.random.uniform(
                k4, (4 * HIDDEN_DIM,), jnp.float32, -bound, bound)
        lstm_params.append(p)
    params["lstm"] = lstm_params
    return params


if __name__ == "__main__":
    # Synthetic "document": two sentences of tokens (strings).
    sents = [
        ["the", "quick", "brown", "fox", "jumps"],
        ["over", "a", "lazy", "dog"],
    ]
    words = sorted({w for s in sents for w in s})
    vocab_stoi = {w: i + 1 for i, w in enumerate(words)}   # 0 = <unk>
    chars = sorted({c for w in words for c in w})
    char_stoi = {c: i + 2 for i, c in enumerate(chars)}    # 0 = <pad>, 1 = <unk>

    params = init_params(jax.random.PRNGKey(0), len(words) + 1, len(chars))
    packed = prepare_params(params)                        # hoisted weight packing

    states, embeds = document_encoder_forward(sents, vocab_stoi, char_stoi,
                                              params, packed)
    states, embeds = jax.block_until_ready((states, embeds))

    n_tok = sum(len(s) for s in sents)
    assert states.shape == (n_tok, 2 * HIDDEN_DIM), states.shape
    assert embeds.shape == (n_tok, EMBED_DIM), embeds.shape
    assert bool(jnp.all(jnp.isfinite(states))) and bool(jnp.all(jnp.isfinite(embeds)))

    ref_states, ref_embeds = reference_forward(sents, vocab_stoi, char_stoi, params)
    assert float(jnp.max(jnp.abs(embeds - ref_embeds))) < 5e-2
    assert float(jnp.max(jnp.abs(states - ref_states))) < 1e-1

    print("KERNEL_OK")
</pallas_src>

<mosaic_0001>
module attributes {stable_mosaic.version = 11 : i64} {
  func.func @_embed_kernel(%arg0: i32, %arg1: memref<16x32xf32, #tpu.memory_space<vmem>>, %arg2: memref<16x16xf32, #tpu.memory_space<vmem>>, %arg3: memref<16x128xbf16, #tpu.memory_space<vmem>>, %arg4: memref<128x128xbf16, #tpu.memory_space<vmem>>, %arg5: memref<1x128xf32, #tpu.memory_space<vmem>>, %arg6: memref<16x128xf32, #tpu.memory_space<vmem>>) attributes {dimension_semantics = [#tpu.dimension_semantics<parallel>], iteration_bounds = array<i64: 1>, scalar_prefetch = 0 : i64, scratch_operands = 0 : i64, tpu.core_type = #tpu.core_type<tc>, window_params = [{transform_indices = @transform_0, window_bounds = array<i64: 16, 32>}, {transform_indices = @transform_1, window_bounds = array<i64: 16, 16>}, {transform_indices = @transform_2, window_bounds = array<i64: 16, 128>}, {pipeline_mode = #tpu.pipeline_mode<synchronous>, transform_indices = @transform_3, window_bounds = array<i64: 128, 128>}, {pipeline_mode = #tpu.pipeline_mode<synchronous>, transform_indices = @transform_4, window_bounds = array<i64: 1, 128>}, {transform_indices = @transform_5, window_bounds = array<i64: 16, 128>}]} {
    %c0 = arith.constant 0 : index
    %c0_0 = arith.constant 0 : index
    %0 = vector.load %arg3[%c0, %c0_0] : memref<16x128xbf16, #tpu.memory_space<vmem>>, vector<16x128xbf16>
    %c0_1 = arith.constant 0 : index
    %c0_2 = arith.constant 0 : index
    %1 = vector.load %arg4[%c0_1, %c0_2] : memref<128x128xbf16, #tpu.memory_space<vmem>>, vector<128x128xbf16>
    %cst = arith.constant dense<0.000000e+00> : vector<16x128xf32>
    %2 = tpu.matmul %0, %1, %cst {dimension_numbers = #tpu.dot_dimension_numbers<[1], [0], [0], [1], [0, 0, 1, 1], [], []>} : vector<16x128xbf16>, vector<128x128xbf16>, vector<16x128xf32> -> vector<16x128xf32>
    %c0_3 = arith.constant 0 : index
    %c0_4 = arith.constant 0 : index
    %3 = vector.load %arg5[%c0_3, %c0_4] : memref<1x128xf32, #tpu.memory_space<vmem>>, vector<1x128xf32>
    %4 = vector.broadcast %3 : vector<1x128xf32> to vector<16x128xf32>
    %5 = arith.addf %2, %4 : vector<16x128xf32>
    %cst_5 = arith.constant 0.000000e+00 : f32
    %6 = vector.broadcast %cst_5 : f32 to vector<16x128xf32>
    %7 = arith.maximumf %5, %6 : vector<16x128xf32>
    %c64_i32 = arith.constant 64 : i32
    %8 = tpu.dynamic_rotate %7 by %c64_i32 dim 1 : vector<16x128xf32>, i32 -> vector<16x128xf32>
    %9 = arith.maximumf %7, %8 : vector<16x128xf32>
    %c32_i32 = arith.constant 32 : i32
    %10 = tpu.dynamic_rotate %9 by %c32_i32 dim 1 : vector<16x128xf32>, i32 -> vector<16x128xf32>
    %11 = arith.maximumf %9, %10 : vector<16x128xf32>
    %c16_i32 = arith.constant 16 : i32
    %12 = tpu.dynamic_rotate %11 by %c16_i32 dim 1 : vector<16x128xf32>, i32 -> vector<16x128xf32>
    %13 = arith.maximumf %11, %12 : vector<16x128xf32>
    %c8_i32 = arith.constant 8 : i32
    %14 = tpu.dynamic_rotate %13 by %c8_i32 dim 1 : vector<16x128xf32>, i32 -> vector<16x128xf32>
    %15 = arith.maximumf %13, %14 : vector<16x128xf32>
    %16 = vector.extract_strided_slice %15 {offsets = [0, 0], sizes = [16, 8], strides = [1, 1]} : vector<16x128xf32> to vector<16x8xf32>
    %cst_6 = arith.constant 0.000000e+00 : f32
    %17 = vector.broadcast %cst_6 : f32 to vector<16x72xf32>
    %c0_7 = arith.constant 0 : index
    %c0_8 = arith.constant 0 : index
    %18 = vector.load %arg1[%c0_7, %c0_8] : memref<16x32xf32, #tpu.memory_space<vmem>>, vector<16x32xf32>
    %c0_9 = arith.constant 0 : index
    %c0_10 = arith.constant 0 : index
    %19 = vector.load %arg2[%c0_9, %c0_10] : memref<16x16xf32, #tpu.memory_space<vmem>>, vector<16x16xf32>
    %20 = tpu.concatenate %18, %19, %16, %17 in 1 : vector<16x32xf32>, vector<16x16xf32>, vector<16x8xf32>, vector<16x72xf32> -> vector<16x128xf32>
    %c0_11 = arith.constant 0 : index
    %c0_12 = arith.constant 0 : index
    %21 = vector.load %arg6[%c0_11, %c0_12] : memref<16x128xf32, #tpu.memory_space<vmem>>, vector<16x128xf32>
    tpu.vector_store %arg6[%c0_11, %c0_12], %20 {strides = array<i32>} : memref<16x128xf32, #tpu.memory_space<vmem>>, vector<16x128xf32>,
    return
  }
  func.func @transform_0(%arg0: i32) -> (i32, i32) {
    %c0_i32 = arith.constant 0 : i32
    %c0_i32_0 = arith.constant 0 : i32
    return %arg0, %c0_i32 : i32, i32
  }
  func.func @transform_1(%arg0: i32) -> (i32, i32) {
    %c0_i32 = arith.constant 0 : i32
    %c0_i32_0 = arith.constant 0 : i32
    return %arg0, %c0_i32 : i32, i32
  }
  func.func @transform_2(%arg0: i32) -> (i32, i32) {
    %c0_i32 = arith.constant 0 : i32
    %c0_i32_0 = arith.constant 0 : i32
    return %arg0, %c0_i32 : i32, i32
  }
  func.func @transform_3(%arg0: i32) -> (i32, i32) {
    %c0_i32 = arith.constant 0 : i32
    %c0_i32_0 = arith.constant 0 : i32
    %c0_i32_1 = arith.constant 0 : i32
    return %c0_i32, %c0_i32_0 : i32, i32
  }
  func.func @transform_4(%arg0: i32) -> (i32, i32) {
    %c0_i32 = arith.constant 0 : i32
    %c0_i32_0 = arith.constant 0 : i32
    %c0_i32_1 = arith.constant 0 : i32
    return %c0_i32, %c0_i32_0 : i32, i32
  }
  func.func @transform_5(%arg0: i32) -> (i32, i32) {
    %c0_i32 = arith.constant 0 : i32
    %c0_i32_0 = arith.constant 0 : i32
    return %arg0, %c0_i32 : i32, i32
  }
}

</mosaic_0001>

<bundles_post_ra>
// kernel: tpu_custom_call.1
= control target key start
LH: loop header
LB: loop body
LE: loop exit
PB: predicated region body
PF: predicated region fallthrough
CT: control target
= control target key end

     0   :  { %10 = vsyncpa [#allocation3], 0  ;;  %s515_s0 = inlined_call_operand.hbm [shape: f32[16,32], index: 0, kind: input, shape index: {}]   ;;  %s516_s1 = inlined_call_operand.hbm [shape: f32[16,16], index: 1, kind: input, shape index: {}]   ;;  %s517_s2 = inlined_call_operand.hbm [shape: bf16[16,128], index: 2, kind: input, shape index: {}]   ;;  %s518_s3 = inlined_call_operand.hbm [shape: bf16[128,128], index: 3, kind: input, shape index: {}]   ;;  %s519_s4 = inlined_call_operand.vmem [shape: f32[1,128], index: 4, kind: input, shape index: {}]   ;;  %s520_s5 = inlined_call_operand.hbm [shape: f32[16,128], index: 5, kind: output, shape index: {}]  }
   0x1   :  { %11 = vsyncpa [#allocation6], 0 }
   0x2   :  { %12 = vsyncpa [#allocation9], 0 }
   0x3   :  { %13 = vsyncpa [#allocation4], 0  ;;  %s31_s20 = sshll.u32 %s516_s1, 4  ;;  %s438_s21 = smov [#allocation5]   ;;  %s32_s20 = int_to_ptr.hbm [resolvable:$true] %s31_s20 }
   0x4   :  { %s33_s22 = sshll.u32 %s438_s21, 4  ;;  %s18_s25 = sshll.u32 %s515_s0, 4  ;;  %s34_s22 = int_to_ptr.vmem [resolvable:$true] %s33_s22  ;;  %s19_s25 = int_to_ptr.hbm [resolvable:$true] %s18_s25 }
   0x5   :  { %s439_s26 = smov 128   ;;  %s440_s27 = smov 8  }
   0x6   :  { %39 = dma.hbm_to_vmem [thread:$0]  %s32_s20, 256, %s34_s22, [#allocation6], %s439_s26, %s439_s26, %s440_s27  }
   0x7   :  { %s441_s28 = smov [#allocation2]   ;;  %s44_s1 = sshll.u32 %s517_s2, 4  ;;  %s45_s1 = int_to_ptr.hbm [resolvable:$true] %s44_s1 }
   0x8   :  { %s20_s29 = sshll.u32 %s441_s28, 4  ;;  %s442_s0 = smov [#allocation7]   ;;  %s21_s29 = int_to_ptr.vmem [resolvable:$true] %s20_s29 }
   0x9   :  { %26 = dma.hbm_to_vmem [thread:$0]  %s19_s25, 256, %s21_s29, [#allocation3], %s439_s26, %s439_s26, %s440_s27  }
   0xa   :  { %s46_s7 = sshll.u32 %s442_s0, 4  ;;  %s57_s10 = sshll.u32 %s518_s3, 4  ;;  %s47_s7 = int_to_ptr.vmem [resolvable:$true] %s46_s7  ;;  %s58_s10 = int_to_ptr.hbm [resolvable:$true] %s57_s10 }
   0xb   :  { %s443_s11 = smov 64   ;;  %s444_s12 = smov 4  }
   0xc   :  { %52 = dma.hbm_to_vmem [thread:$0]  %s45_s1, 128, %s47_s7, [#allocation6], %s443_s11, %s443_s11, %s444_s12  }
   0xd   :  { %s445_s2 = smov [#allocation8]  }
   0xe   :  { %s59_s13 = sshll.u32 %s445_s2, 4  ;;  %s60_s13 = int_to_ptr.vmem [resolvable:$true] %s59_s13 }
   0xf   :  { %65 = dma.hbm_to_vmem [thread:$0]  %s58_s10, 1024, %s60_s13, [#allocation9], %s443_s11, %s443_s11, %s444_s12  }
  0x10   :  { %430 = dma.done.wait [#allocation3], 256  }
  0x11   :  { %431 = vsyncadd [#allocation3], 4294967040 }
  0x12   :  { %432 = dma.done.wait [#allocation6], 384  }
  0x13   :  { %433 = vsyncadd [#allocation6], 4294966912 }
  0x14   :  { %434 = dma.done.wait [#allocation9], 1024  }
  0x15   :  { %435 = vsyncadd [#allocation9], 4294966272  ;;  %v296_v0 = vld [vmem:[#allocation8 + $0x38] sm:$0xff]  ;;  %v295_v1 = vld [vmem:[#allocation8 + $0x30] sm:$0xff]  ;;  %s446_s15 = smov 32   ;;  %s448_s16 = smov 48  }
  0x16   :  { %160 = vmatpush.bf16.msra.mxu0 %v296_v0  ;;  %v294_v2 = vld [vmem:[#allocation8 + $0x28] sm:$0xff]  ;;  %v293_v3 = vld [vmem:[#allocation8 + $0x20] sm:$0xff]  ;;  %v292_v4 = vld [vmem:[#allocation8 + $0x18] sm:$0xff]  ;;  %vm220_vm0 = vcmask 261120   ;;  %vm223_vm1 = vcmask 392192   ;;  %vm226_vm2 = vcmask 457728  }
  0x17   :  { %v291_v5 = vld [vmem:[#allocation8 + $0x10] sm:$0xff]  ;;  %v290_v6 = vld [vmem:[#allocation8 + $0x8] sm:$0xff]  ;;  %v289_v7 = vld [vmem:[#allocation8] sm:$0xff]  ;;  %s449_s17 = smov [#allocation10]   ;;  %s237_s21 = sshll.u32 %s520_s5, 4  ;;  %s238_s21 = int_to_ptr.hbm [resolvable:$true] %s237_s21 }
  0x18   :  { %v288_v8 = vld [vmem:[#allocation7] sm:$0xff]  ;;  %v203_v27 = vld [vmem:[#allocation5 + $0x8] sm:$0xff]  ;;  %v202_v29 = vld [vmem:[#allocation5] sm:$0xff]  ;;  %s235_s18 = sshll.u32 %s449_s17, 4  ;;  %s236_s18 = int_to_ptr.vmem [resolvable:$true] %s235_s18 }
  0x19   :  { %v309_v9 = vld [vmem:[%s519_s4] ss:$0 sm:$0xff]  ;;  %s447_s4 = smov 16   ;;  %v201_v35 = vld [vmem:[#allocation2 + $0x8] sm:$0xff] }
  0x1a   :  { %161 = vmatpush.bf16.msra.mxu0 %v295_v1  ;;  %v200_v41 = vld [vmem:[#allocation2] sm:$0xff] }
  0x1e   :  { %162 = vmatpush.bf16.msra.mxu0 %v294_v2 }
  0x22   :  { %163 = vmatpush.bf16.msra.mxu0 %v293_v3 }
  0x26   :  { %164 = vmatpush.bf16.msra.mxu0 %v292_v4 }
  0x2a   :  { %165 = vmatpush.bf16.msra.mxu0 %v291_v5 }
  0x2e   :  { %166 = vmatpush.bf16.msra.mxu0 %v290_v6 }
  0x32   :  { %167 = vmatpush.bf16.msra.mxu0 %v289_v7 }
  0x35   :  { %168 = vmatmul.bf16.vlgmr.msra.gmra.mxu0 %v288_v8 }
  0xb2   :  { %v169_v10 = vpop.f32.mrf.mxu0 }
  0xb3   :  { %v170_v11 = vadd.f32 %v309_v9, %v169_v10 }
  0xb5   :  { %v174_v12 = vmax.f32 %v170_v11, 0.0 }
  0xb7   :  { %176 = vrot.lane.b32.xlu0 %v174_v12, %s443_s11 }
  0xba   :  { %v171_v13 = vpop.f32.mrf.mxu0 }
  0xbb   :  { %v172_v14 = vadd.f32 %v309_v9, %v171_v13 }
  0xbd   :  { %v175_v15 = vmax.f32 %v172_v14, 0.0 }
  0xbf   :  { %178 = vrot.lane.b32.xlu0 %v175_v15, %s443_s11 }
 0x129   :  { %v177_v16 = vpop.permute.xlu0 %176 }
 0x12a   :  { %v180_v17 = vmax.f32 %v174_v12, %v177_v16 }
 0x12c   :  { %182 = vrot.lane.b32.xlu1 %v180_v17, %s446_s15 }
 0x131   :  { %v179_v18 = vpop.permute.xlu0 %178 }
 0x132   :  { %v181_v19 = vmax.f32 %v175_v15, %v179_v18 }
 0x134   :  { %184 = vrot.lane.b32.xlu1 %v181_v19, %s446_s15 }
 0x19e   :  { %v183_v20 = vpop.permute.xlu1 %182 }
 0x19f   :  { %v186_v21 = vmax.f32 %v180_v17, %v183_v20 }
 0x1a1   :  { %188 = vrot.lane.b32.xlu2 %v186_v21, %s447_s4 }
 0x1a6   :  { %v185_v22 = vpop.permute.xlu1 %184 }
 0x1a7   :  { %v187_v23 = vmax.f32 %v181_v19, %v185_v22 }
 0x1a9   :  { %190 = vrot.lane.b32.xlu2 %v187_v23, %s447_s4 }
 0x1b1   :  { %206 = vrot.lane.b32.xlu2 %v202_v29, %s446_s15 }
 0x1fb   :  { %v189_v24 = vpop.permute.xlu2 %188 }
 0x1fc   :  { %v192_v25 = vmax.f32 %v186_v21, %v189_v24 }
 0x1fe   :  { %194 = vrot.lane.b32.xlu0 %v192_v25, %s440_s27 }
 0x203   :  { %v191_v26 = vpop.permute.xlu2 %190 }
 0x204   :  { %v193_v28 = vmax.f32 %v187_v23, %v191_v26 }
 0x206   :  { %196 = vrot.lane.b32.xlu1 %v193_v28, %s440_s27  ;;  %208 = vrot.lane.b32.xlu0 %v203_v27, %s446_s15 }
 0x20b   :  { %v207_v34 = vpop.permute.xlu2 %206 }
 0x20c   :  { %v221_v42 = vsel %vm220_vm0, %v200_v41, %v207_v34 }
 0x270   :  { %v195_v30 = vpop.permute.xlu0 %194 }
 0x271   :  { %v198_v31 = vmax.f32 %v192_v25, %v195_v30 }
 0x273   :  { %214 = vrot.lane.b32.xlu1 %v198_v31, %s448_s16 }
 0x278   :  { %v197_v32 = vpop.permute.xlu1 %196  ;;  %v209_v36 = vpop.permute.xlu0 %208 }
 0x279   :  { %v199_v33 = vmax.f32 %v193_v28, %v197_v32  ;;  %v222_v37 = vsel %vm220_vm0, %v201_v35, %v209_v36 }
 0x27b   :  { %216 = vrot.lane.b32.xlu2 %v199_v33, %s448_s16 }
 0x2d5   :  { %v217_v38 = vpop.permute.xlu2 %216 }
 0x2d6   :  { %v225_v39 = vsel %vm223_vm1, %v222_v37, %v217_v38 }
 0x2d7   :  { %v228_v40 = vsel %vm226_vm2, %v225_v39, 0.0 }
 0x2d8   :  { %230 = vst [vmem:[#allocation10 + $0x8] sm:$0xff] %v228_v40 }
 0x2e5   :  { %v215_v43 = vpop.permute.xlu1 %214 }
 0x2e6   :  { %v224_v44 = vsel %vm223_vm1, %v221_v42, %v215_v43 }
 0x2e7   :  { %v227_v45 = vsel %vm226_vm2, %v224_v44, 0.0 }
 0x2e8   :  { %229 = vst [vmem:[#allocation10] sm:$0xff] %v227_v45 }
 0x2e9   :  { %243 = dma.vmem_to_hbm [thread:$0]  %s236_s18, 256, %s238_s21, [#allocation4], %s439_s26, %s439_s26, %s440_s27  }
 0x2ea   :  { %436 = dma.done.wait [#allocation4], 256  }
 0x2eb   :  { %437 = vsyncadd [#allocation4], 4294967040 }
 0x2ec   :  { %248 = vsyncpa [#allocation3], 1 }
 0x2ed   :  { %249 = vsyncpa [#allocation6], 1 }
 0x2ee   :  { %250 = vsyncpa [#allocation9], 1 }
 0x2ef   :  { %251 = vsyncpa [#allocation4], 1 }

</bundles_post_ra>
